<compile_context>
chip_gen: v7x
topology: tpu7x:2x2x1
jax: 0.10.0
libtpu: 0.0.40
codegen_flags: <defaults>
</compile_context>

<pallas_src>
import functools
import math

import jax
import jax.numpy as jnp
from jax import lax
from jax.experimental import pallas as pl
from jax.experimental.pallas import tpu as pltpu

D_MODEL = 8
NUM_HEADS = 2                      # H
D_HEAD = D_MODEL // NUM_HEADS      # 4
BATCH = 2
SEQ = NUM_HEADS * NUM_HEADS        # 4  (reshape chain requires S == H*H)
BS = BATCH * SEQ                   # 8 rows = exactly one sublane group

_HIGH = jax.lax.Precision.HIGHEST


def _f32dot(a, b):
    return jnp.dot(a, b, preferred_element_type=jnp.float32, precision=_HIGH)


def _gsum_lanes(x, lo_mask):
    """Sum within each 4-lane head group of the 8-lane axis, broadcast back (VPU/XLU)."""
    part = jnp.sum(jnp.where(lo_mask, x, 0.0), axis=-1, keepdims=True)
    tot = jnp.sum(x, axis=-1, keepdims=True)
    return jnp.where(lo_mask, part, tot - part)


def _gsum_rows(x, hi_mask):
    """Sum within each 4-row batch group of the 8-row axis, broadcast back (VPU/XLU)."""
    part = jnp.sum(jnp.where(hi_mask, x, 0.0), axis=0, keepdims=True)
    tot = jnp.sum(x, axis=0, keepdims=True)
    return jnp.where(hi_mask, part, tot - part)


# ------------------------------ fused kernel --------------------------------
#
# Row layout: r = b*4 + s (8 rows).  Lane layout: c = h*4 + d (8 lanes).
# Weight stack w_ref (8, 8, 8):
#   0: wq.T   1: wk.T   2: wk.T@J (head-swapped)   3: wv.T   4: wv.T@J
#   5: wo.T   6: J@wo.T (ws.T)                      7: Ppair (adjacent-row swap)
# Bias stack b_ref (6, 8): bq, bk, bk@J, bv, bv@J, bo

def _fused_forward_kernel(x1_ref, x2_ref, x3_ref, w_ref, b_ref, o_ref, *, scale):
    lane = lax.broadcasted_iota(jnp.int32, (BS, D_MODEL), 1)
    row = lax.broadcasted_iota(jnp.int32, (BS, D_MODEL), 0)
    lane_lo = lane < D_HEAD            # head-0 lanes
    row_b0 = row < SEQ                 # batch-0 rows
    row_even = (row & 1) == 0

    x1 = x1_ref[...]
    x2 = x2_ref[...]
    x3 = x3_ref[...]

    # -- five mutually independent projection dots (MXU, HIGHEST = exact f32) --
    q = _f32dot(x1, w_ref[0]) + b_ref[0:1, :]          # q[b*4+s, h*4+d]
    k = _f32dot(x2, w_ref[1]) + b_ref[1:2, :]
    kswap = _f32dot(x2, w_ref[2]) + b_ref[2:3, :]      # k with head halves swapped
    v = _f32dot(x3, w_ref[3]) + b_ref[3:4, :]
    vswap = _f32dot(x3, w_ref[4]) + b_ref[4:5, :]      # v with head halves swapped

    # -- attention scores s[b, h, g] in broadcast (8, 8) form (VPU + XLU only) --
    # sd[r, c in head h] = scale * sum_{s,d} q[b,s,h4+d] k[b,s,h4+d]   (g == h)
    # so[r, c in head h] = scale * sum_{s,d} q[b,s,h4+d] k[b,s,(1-h)4+d] (g == 1-h)
    sd = scale * _gsum_rows(_gsum_lanes(q * k, lane_lo), row_b0)
    so = scale * _gsum_rows(_gsum_lanes(q * kswap, lane_lo), row_b0)

    # -- numerically stable 2-way softmax over the key-head axis g --
    m = jnp.maximum(sd, so)
    ed = jnp.exp(sd - m)
    eo = jnp.exp(so - m)
    inv = 1.0 / (ed + eo)              # exact; approx reciprocal risks the 1e-4 check
    # TODO(synk): nn.Dropout(p=0.1) treated as identity (eval-mode semantics).

    # -- weighted sum over V, head-block layout: rh[b*4+s, h*4+d] = result[b,h,s*4+d]
    rh = (ed * inv) * v + (eo * inv) * vswap

    # -- result.reshape(B,H,H,-1).permute(0,2,1,3).reshape(B,S,D) folded into the
    #    output projection:  out = stay @ wo.T + Ppair @ (moved @ ws.T) + bo
    x_stay = jnp.where(row_even == lane_lo, rh, 0.0)   # part that keeps its row
    z_moved = rh - x_stay                              # part that moves to the pair row
    out_stay = _f32dot(x_stay, w_ref[5])
    moved = _f32dot(z_moved, w_ref[6])
    o_ref[...] = out_stay + _f32dot(w_ref[7], moved) + b_ref[5:6, :]


# ------------------------------- model glue ---------------------------------

def init_params(key, d_model):
    ks = jax.random.split(key, 8)
    bound = 1.0 / math.sqrt(d_model)

    def u(k, shape):
        return jax.random.uniform(k, shape, jnp.float32, -bound, bound)

    return {
        "wq": u(ks[0], (d_model, d_model)), "bq": u(ks[1], (d_model,)),
        "wk": u(ks[2], (d_model, d_model)), "bk": u(ks[3], (d_model,)),
        "wv": u(ks[4], (d_model, d_model)), "bv": u(ks[5], (d_model,)),
        "wo": u(ks[6], (d_model, d_model)), "bo": u(ks[7], (d_model,)),
    }


def prepare_params(params):
    """One-time (hoisted) packing of all weights/biases used by the kernel."""
    perm = jnp.array([4, 5, 6, 7, 0, 1, 2, 3], dtype=jnp.int32)   # head-half swap J
    pair = jnp.array([1, 0, 3, 2, 5, 4, 7, 6], dtype=jnp.int32)   # adjacent row swap
    wq_t = params["wq"].T
    wk_t = params["wk"].T
    wv_t = params["wv"].T
    wo_t = params["wo"].T
    ppair = jnp.eye(BS, dtype=jnp.float32)[pair]                  # Ppair[i,j]=1 iff j==i^1
    w = jnp.stack([
        wq_t,                # 0
        wk_t,                # 1
        wk_t[:, perm],       # 2: wk.T @ J
        wv_t,                # 3
        wv_t[:, perm],       # 4: wv.T @ J
        wo_t,                # 5
        wo_t[perm, :],       # 6: J @ wo.T
        ppair,               # 7
    ]).astype(jnp.float32)
    b = jnp.stack([
        params["bq"],
        params["bk"],
        params["bk"][perm],
        params["bv"],
        params["bv"][perm],
        params["bo"],
    ]).astype(jnp.float32)
    return {"w": w, "b": b}


@jax.jit
def model_forward(packed, x1, x2, x3):
    B, S, D = x1.shape
    assert (B, S, D) == (BATCH, SEQ, D_MODEL)
    x1f = x1.reshape(B * S, D)
    x2f = x2.reshape(B * S, D)
    x3f = x3.reshape(B * S, D)

    vmem = pl.BlockSpec(memory_space=pltpu.MemorySpace.VMEM)
    scale = 1.0 / math.sqrt(D // NUM_HEADS)
    out2d = pl.pallas_call(
        functools.partial(_fused_forward_kernel, scale=scale),
        out_shape=jax.ShapeDtypeStruct((B * S, D), jnp.float32),
        in_specs=[vmem] * 5,
        out_specs=vmem,
    )(x1f, x2f, x3f, packed["w"], packed["b"])
    return out2d.reshape(B, S, D)


def reference_forward(params, x1, x2, x3):
    """Pure-JAX mirror of the PyTorch forward (dropout = identity)."""
    B, S, D = x1.shape
    H, Dh = NUM_HEADS, D // NUM_HEADS
    hi = jax.lax.Precision.HIGHEST
    lin = lambda x, w, b: jnp.einsum("bsd,od->bso", x, w, precision=hi) + b
    q = lin(x1, params["wq"], params["bq"])
    k = lin(x2, params["wk"], params["bk"])
    v = lin(x3, params["wv"], params["bv"])
    th = lambda t: t.reshape(B, S, H, Dh).transpose(0, 2, 1, 3).reshape(B, H, S * Dh)
    q, k, v = th(q), th(k), th(v)
    s = jnp.einsum("bhf,bgf->bhg", q, k, precision=hi) / math.sqrt(D // H)
    p = jax.nn.softmax(s, axis=-1)
    r = jnp.einsum("bhg,bgf->bhf", p, v, precision=hi)
    r = r.reshape(B, H, H, -1).transpose(0, 2, 1, 3).reshape(B, -1, S * Dh // H)
    return lin(r, params["wo"], params["bo"])


if __name__ == "__main__":
    key = jax.random.PRNGKey(0)
    kp, k1, k2, k3 = jax.random.split(key, 4)

    params = init_params(kp, D_MODEL)
    packed = jax.tree_util.tree_map(jax.block_until_ready,
                                    prepare_params(params))   # hoisted, one-time

    x1 = jax.random.normal(k1, (BATCH, SEQ, D_MODEL), jnp.float32)
    x2 = jax.random.normal(k2, (BATCH, SEQ, D_MODEL), jnp.float32)
    x3 = jax.random.normal(k3, (BATCH, SEQ, D_MODEL), jnp.float32)

    out = model_forward(packed, x1, x2, x3)
    out = jax.block_until_ready(out)

    ref = reference_forward(params, x1, x2, x3)
    assert out.shape == (BATCH, SEQ, D_MODEL), out.shape
    max_err = float(jnp.max(jnp.abs(out - ref)))
    assert jnp.allclose(out, ref, atol=1e-4, rtol=1e-4), max_err

    print("KERNEL_OK")
</pallas_src>

<mosaic_0001>
module attributes {stable_mosaic.version = 11 : i64} {
  func.func @_fused_forward_kernel(%arg0: memref<8x8xf32, #tpu.memory_space<vmem>>, %arg1: memref<8x8xf32, #tpu.memory_space<vmem>>, %arg2: memref<8x8xf32, #tpu.memory_space<vmem>>, %arg3: memref<8x8x8xf32, #tpu.memory_space<vmem>>, %arg4: memref<6x8xf32, #tpu.memory_space<vmem>>, %arg5: memref<8x8xf32, #tpu.memory_space<vmem>>) attributes {dimension_semantics = [], scalar_prefetch = 0 : i64, scratch_operands = 0 : i64, tpu.core_type = #tpu.core_type<tc>} {
    %0 = tpu.iota {dimensions = array<i32: 1>} : vector<8x8xi32>
    %1 = tpu.iota {dimensions = array<i32: 0>} : vector<8x8xi32>
    %c4_i32 = arith.constant 4 : i32
    %2 = vector.broadcast %c4_i32 : i32 to vector<8x8xi32>
    %3 = arith.cmpi slt, %0, %2 : vector<8x8xi32>
    %c4_i32_0 = arith.constant 4 : i32
    %4 = vector.broadcast %c4_i32_0 : i32 to vector<8x8xi32>
    %5 = arith.cmpi slt, %1, %4 : vector<8x8xi32>
    %c1_i32 = arith.constant 1 : i32
    %6 = vector.broadcast %c1_i32 : i32 to vector<8x8xi32>
    %7 = arith.andi %1, %6 : vector<8x8xi32>
    %c0_i32 = arith.constant 0 : i32
    %8 = vector.broadcast %c0_i32 : i32 to vector<8x8xi32>
    %9 = arith.cmpi eq, %7, %8 : vector<8x8xi32>
    %c0 = arith.constant 0 : index
    %c0_1 = arith.constant 0 : index
    %10 = vector.load %arg0[%c0, %c0_1] : memref<8x8xf32, #tpu.memory_space<vmem>>, vector<8x8xf32>
    %c0_2 = arith.constant 0 : index
    %c0_3 = arith.constant 0 : index
    %11 = vector.load %arg1[%c0_2, %c0_3] : memref<8x8xf32, #tpu.memory_space<vmem>>, vector<8x8xf32>
    %c0_4 = arith.constant 0 : index
    %c0_5 = arith.constant 0 : index
    %12 = vector.load %arg2[%c0_4, %c0_5] : memref<8x8xf32, #tpu.memory_space<vmem>>, vector<8x8xf32>
    %c0_6 = arith.constant 0 : index
    %c0_7 = arith.constant 0 : index
    %c0_8 = arith.constant 0 : index
    %13 = vector.load %arg3[%c0_6, %c0_7, %c0_8] : memref<8x8x8xf32, #tpu.memory_space<vmem>>, vector<1x8x8xf32>
    %14 = vector.shape_cast %13 : vector<1x8x8xf32> to vector<8x8xf32>
    %cst = arith.constant dense<0.000000e+00> : vector<8x8xf32>
    %15 = tpu.matmul %10, %14, %cst {dimension_numbers = #tpu.dot_dimension_numbers<[1], [0], [0], [1], [0, 0, 1, 1], [], []>, precision = #tpu.contract_precision<fp32>} : vector<8x8xf32>, vector<8x8xf32>, vector<8x8xf32> -> vector<8x8xf32>
    %c0_9 = arith.constant 0 : index
    %c0_10 = arith.constant 0 : index
    %16 = vector.load %arg4[%c0_9, %c0_10] : memref<6x8xf32, #tpu.memory_space<vmem>>, vector<1x8xf32>
    %17 = vector.broadcast %16 : vector<1x8xf32> to vector<8x8xf32>
    %18 = arith.addf %15, %17 : vector<8x8xf32>
    %c1 = arith.constant 1 : index
    %c0_11 = arith.constant 0 : index
    %c0_12 = arith.constant 0 : index
    %19 = vector.load %arg3[%c1, %c0_11, %c0_12] : memref<8x8x8xf32, #tpu.memory_space<vmem>>, vector<1x8x8xf32>
    %20 = vector.shape_cast %19 : vector<1x8x8xf32> to vector<8x8xf32>
    %cst_13 = arith.constant dense<0.000000e+00> : vector<8x8xf32>
    %21 = tpu.matmul %11, %20, %cst_13 {dimension_numbers = #tpu.dot_dimension_numbers<[1], [0], [0], [1], [0, 0, 1, 1], [], []>, precision = #tpu.contract_precision<fp32>} : vector<8x8xf32>, vector<8x8xf32>, vector<8x8xf32> -> vector<8x8xf32>
    %c1_14 = arith.constant 1 : index
    %c0_15 = arith.constant 0 : index
    %22 = vector.load %arg4[%c1_14, %c0_15] : memref<6x8xf32, #tpu.memory_space<vmem>>, vector<1x8xf32>
    %23 = vector.broadcast %22 : vector<1x8xf32> to vector<8x8xf32>
    %24 = arith.addf %21, %23 : vector<8x8xf32>
    %c2 = arith.constant 2 : index
    %c0_16 = arith.constant 0 : index
    %c0_17 = arith.constant 0 : index
    %25 = vector.load %arg3[%c2, %c0_16, %c0_17] : memref<8x8x8xf32, #tpu.memory_space<vmem>>, vector<1x8x8xf32>
    %26 = vector.shape_cast %25 : vector<1x8x8xf32> to vector<8x8xf32>
    %cst_18 = arith.constant dense<0.000000e+00> : vector<8x8xf32>
    %27 = tpu.matmul %11, %26, %cst_18 {dimension_numbers = #tpu.dot_dimension_numbers<[1], [0], [0], [1], [0, 0, 1, 1], [], []>, precision = #tpu.contract_precision<fp32>} : vector<8x8xf32>, vector<8x8xf32>, vector<8x8xf32> -> vector<8x8xf32>
    %c2_19 = arith.constant 2 : index
    %c0_20 = arith.constant 0 : index
    %28 = vector.load %arg4[%c2_19, %c0_20] : memref<6x8xf32, #tpu.memory_space<vmem>>, vector<1x8xf32>
    %29 = vector.broadcast %28 : vector<1x8xf32> to vector<8x8xf32>
    %30 = arith.addf %27, %29 : vector<8x8xf32>
    %c3 = arith.constant 3 : index
    %c0_21 = arith.constant 0 : index
    %c0_22 = arith.constant 0 : index
    %31 = vector.load %arg3[%c3, %c0_21, %c0_22] : memref<8x8x8xf32, #tpu.memory_space<vmem>>, vector<1x8x8xf32>
    %32 = vector.shape_cast %31 : vector<1x8x8xf32> to vector<8x8xf32>
    %cst_23 = arith.constant dense<0.000000e+00> : vector<8x8xf32>
    %33 = tpu.matmul %12, %32, %cst_23 {dimension_numbers = #tpu.dot_dimension_numbers<[1], [0], [0], [1], [0, 0, 1, 1], [], []>, precision = #tpu.contract_precision<fp32>} : vector<8x8xf32>, vector<8x8xf32>, vector<8x8xf32> -> vector<8x8xf32>
    %c3_24 = arith.constant 3 : index
    %c0_25 = arith.constant 0 : index
    %34 = vector.load %arg4[%c3_24, %c0_25] : memref<6x8xf32, #tpu.memory_space<vmem>>, vector<1x8xf32>
    %35 = vector.broadcast %34 : vector<1x8xf32> to vector<8x8xf32>
    %36 = arith.addf %33, %35 : vector<8x8xf32>
    %c4 = arith.constant 4 : index
    %c0_26 = arith.constant 0 : index
    %c0_27 = arith.constant 0 : index
    %37 = vector.load %arg3[%c4, %c0_26, %c0_27] : memref<8x8x8xf32, #tpu.memory_space<vmem>>, vector<1x8x8xf32>
    %38 = vector.shape_cast %37 : vector<1x8x8xf32> to vector<8x8xf32>
    %cst_28 = arith.constant dense<0.000000e+00> : vector<8x8xf32>
    %39 = tpu.matmul %12, %38, %cst_28 {dimension_numbers = #tpu.dot_dimension_numbers<[1], [0], [0], [1], [0, 0, 1, 1], [], []>, precision = #tpu.contract_precision<fp32>} : vector<8x8xf32>, vector<8x8xf32>, vector<8x8xf32> -> vector<8x8xf32>
    %c4_29 = arith.constant 4 : index
    %c0_30 = arith.constant 0 : index
    %40 = vector.load %arg4[%c4_29, %c0_30] : memref<6x8xf32, #tpu.memory_space<vmem>>, vector<1x8xf32>
    %41 = vector.broadcast %40 : vector<1x8xf32> to vector<8x8xf32>
    %42 = arith.addf %39, %41 : vector<8x8xf32>
    %43 = arith.mulf %18, %24 : vector<8x8xf32>
    %cst_31 = arith.constant 0.000000e+00 : f32
    %44 = vector.broadcast %cst_31 : f32 to vector<8x8xf32>
    %45 = arith.select %3, %43, %44 : vector<8x8xi1>, vector<8x8xf32>
    %cst_32 = arith.constant dense<0.000000e+00> : vector<8xf32>
    %46 = vector.multi_reduction <add>, %45, %cst_32 [1] : vector<8x8xf32> to vector<8xf32>
    %47 = vector.shape_cast %46 : vector<8xf32> to vector<8x1xf32>
    %cst_33 = arith.constant dense<0.000000e+00> : vector<8xf32>
    %48 = vector.multi_reduction <add>, %43, %cst_33 [1] : vector<8x8xf32> to vector<8xf32>
    %49 = vector.shape_cast %48 : vector<8xf32> to vector<8x1xf32>
    %50 = arith.subf %49, %47 : vector<8x1xf32>
    %51 = vector.shape_cast %47 : vector<8x1xf32> to vector<8x1xf32>
    %52 = vector.broadcast %51 : vector<8x1xf32> to vector<8x8xf32>
    %53 = vector.shape_cast %50 : vector<8x1xf32> to vector<8x1xf32>
    %54 = vector.broadcast %53 : vector<8x1xf32> to vector<8x8xf32>
    %55 = arith.select %3, %52, %54 : vector<8x8xi1>, vector<8x8xf32>
    %cst_34 = arith.constant 0.000000e+00 : f32
    %56 = vector.broadcast %cst_34 : f32 to vector<8x8xf32>
    %57 = arith.select %5, %55, %56 : vector<8x8xi1>, vector<8x8xf32>
    %cst_35 = arith.constant dense<0.000000e+00> : vector<8xf32>
    %58 = vector.multi_reduction <add>, %57, %cst_35 [0] : vector<8x8xf32> to vector<8xf32>
    %59 = vector.shape_cast %58 : vector<8xf32> to vector<1x8xf32>
    %cst_36 = arith.constant dense<0.000000e+00> : vector<8xf32>
    %60 = vector.multi_reduction <add>, %55, %cst_36 [0] : vector<8x8xf32> to vector<8xf32>
    %61 = vector.shape_cast %60 : vector<8xf32> to vector<1x8xf32>
    %62 = arith.subf %61, %59 : vector<1x8xf32>
    %63 = vector.shape_cast %59 : vector<1x8xf32> to vector<1x8xf32>
    %64 = vector.broadcast %63 : vector<1x8xf32> to vector<8x8xf32>
    %65 = vector.shape_cast %62 : vector<1x8xf32> to vector<1x8xf32>
    %66 = vector.broadcast %65 : vector<1x8xf32> to vector<8x8xf32>
    %67 = arith.select %5, %64, %66 : vector<8x8xi1>, vector<8x8xf32>
    %cst_37 = arith.constant 5.000000e-01 : f32
    %68 = vector.broadcast %cst_37 : f32 to vector<8x8xf32>
    %69 = arith.mulf %68, %67 : vector<8x8xf32>
    %70 = arith.mulf %18, %30 : vector<8x8xf32>
    %cst_38 = arith.constant 0.000000e+00 : f32
    %71 = vector.broadcast %cst_38 : f32 to vector<8x8xf32>
    %72 = arith.select %3, %70, %71 : vector<8x8xi1>, vector<8x8xf32>
    %cst_39 = arith.constant dense<0.000000e+00> : vector<8xf32>
    %73 = vector.multi_reduction <add>, %72, %cst_39 [1] : vector<8x8xf32> to vector<8xf32>
    %74 = vector.shape_cast %73 : vector<8xf32> to vector<8x1xf32>
    %cst_40 = arith.constant dense<0.000000e+00> : vector<8xf32>
    %75 = vector.multi_reduction <add>, %70, %cst_40 [1] : vector<8x8xf32> to vector<8xf32>
    %76 = vector.shape_cast %75 : vector<8xf32> to vector<8x1xf32>
    %77 = arith.subf %76, %74 : vector<8x1xf32>
    %78 = vector.shape_cast %74 : vector<8x1xf32> to vector<8x1xf32>
    %79 = vector.broadcast %78 : vector<8x1xf32> to vector<8x8xf32>
    %80 = vector.shape_cast %77 : vector<8x1xf32> to vector<8x1xf32>
    %81 = vector.broadcast %80 : vector<8x1xf32> to vector<8x8xf32>
    %82 = arith.select %3, %79, %81 : vector<8x8xi1>, vector<8x8xf32>
    %cst_41 = arith.constant 0.000000e+00 : f32
    %83 = vector.broadcast %cst_41 : f32 to vector<8x8xf32>
    %84 = arith.select %5, %82, %83 : vector<8x8xi1>, vector<8x8xf32>
    %cst_42 = arith.constant dense<0.000000e+00> : vector<8xf32>
    %85 = vector.multi_reduction <add>, %84, %cst_42 [0] : vector<8x8xf32> to vector<8xf32>
    %86 = vector.shape_cast %85 : vector<8xf32> to vector<1x8xf32>
    %cst_43 = arith.constant dense<0.000000e+00> : vector<8xf32>
    %87 = vector.multi_reduction <add>, %82, %cst_43 [0] : vector<8x8xf32> to vector<8xf32>
    %88 = vector.shape_cast %87 : vector<8xf32> to vector<1x8xf32>
    %89 = arith.subf %88, %86 : vector<1x8xf32>
    %90 = vector.shape_cast %86 : vector<1x8xf32> to vector<1x8xf32>
    %91 = vector.broadcast %90 : vector<1x8xf32> to vector<8x8xf32>
    %92 = vector.shape_cast %89 : vector<1x8xf32> to vector<1x8xf32>
    %93 = vector.broadcast %92 : vector<1x8xf32> to vector<8x8xf32>
    %94 = arith.select %5, %91, %93 : vector<8x8xi1>, vector<8x8xf32>
    %cst_44 = arith.constant 5.000000e-01 : f32
    %95 = vector.broadcast %cst_44 : f32 to vector<8x8xf32>
    %96 = arith.mulf %95, %94 : vector<8x8xf32>
    %97 = arith.maximumf %69, %96 : vector<8x8xf32>
    %98 = arith.subf %69, %97 : vector<8x8xf32>
    %99 = math.exp %98 : vector<8x8xf32>
    %100 = arith.subf %96, %97 : vector<8x8xf32>
    %101 = math.exp %100 : vector<8x8xf32>
    %102 = arith.addf %99, %101 : vector<8x8xf32>
    %cst_45 = arith.constant 1.000000e+00 : f32
    %103 = vector.broadcast %cst_45 : f32 to vector<8x8xf32>
    %104 = arith.divf %103, %102 : vector<8x8xf32>
    %105 = arith.mulf %99, %104 : vector<8x8xf32>
    %106 = arith.mulf %105, %36 : vector<8x8xf32>
    %107 = arith.mulf %101, %104 : vector<8x8xf32>
    %108 = arith.mulf %107, %42 : vector<8x8xf32>
    %109 = arith.addf %106, %108 : vector<8x8xf32>
    %110 = arith.xori %9, %3 : vector<8x8xi1>
    %cst_46 = arith.constant dense<true> : vector<8x8xi1>
    %111 = arith.xori %110, %cst_46 : vector<8x8xi1>
    %cst_47 = arith.constant 0.000000e+00 : f32
    %112 = vector.broadcast %cst_47 : f32 to vector<8x8xf32>
    %113 = arith.select %111, %109, %112 : vector<8x8xi1>, vector<8x8xf32>
    %114 = arith.subf %109, %113 : vector<8x8xf32>
    %c5 = arith.constant 5 : index
    %c0_48 = arith.constant 0 : index
    %c0_49 = arith.constant 0 : index
    %115 = vector.load %arg3[%c5, %c0_48, %c0_49] : memref<8x8x8xf32, #tpu.memory_space<vmem>>, vector<1x8x8xf32>
    %116 = vector.shape_cast %115 : vector<1x8x8xf32> to vector<8x8xf32>
    %cst_50 = arith.constant dense<0.000000e+00> : vector<8x8xf32>
    %117 = tpu.matmul %113, %116, %cst_50 {dimension_numbers = #tpu.dot_dimension_numbers<[1], [0], [0], [1], [0, 0, 1, 1], [], []>, precision = #tpu.contract_precision<fp32>} : vector<8x8xf32>, vector<8x8xf32>, vector<8x8xf32> -> vector<8x8xf32>
    %c6 = arith.constant 6 : index
    %c0_51 = arith.constant 0 : index
    %c0_52 = arith.constant 0 : index
    %118 = vector.load %arg3[%c6, %c0_51, %c0_52] : memref<8x8x8xf32, #tpu.memory_space<vmem>>, vector<1x8x8xf32>
    %119 = vector.shape_cast %118 : vector<1x8x8xf32> to vector<8x8xf32>
    %cst_53 = arith.constant dense<0.000000e+00> : vector<8x8xf32>
    %120 = tpu.matmul %114, %119, %cst_53 {dimension_numbers = #tpu.dot_dimension_numbers<[1], [0], [0], [1], [0, 0, 1, 1], [], []>, precision = #tpu.contract_precision<fp32>} : vector<8x8xf32>, vector<8x8xf32>, vector<8x8xf32> -> vector<8x8xf32>
    %c7 = arith.constant 7 : index
    %c0_54 = arith.constant 0 : index
    %c0_55 = arith.constant 0 : index
    %121 = vector.load %arg3[%c7, %c0_54, %c0_55] : memref<8x8x8xf32, #tpu.memory_space<vmem>>, vector<1x8x8xf32>
    %122 = vector.shape_cast %121 : vector<1x8x8xf32> to vector<8x8xf32>
    %cst_56 = arith.constant dense<0.000000e+00> : vector<8x8xf32>
    %123 = tpu.matmul %122, %120, %cst_56 {dimension_numbers = #tpu.dot_dimension_numbers<[1], [0], [0], [1], [0, 0, 1, 1], [], []>, precision = #tpu.contract_precision<fp32>} : vector<8x8xf32>, vector<8x8xf32>, vector<8x8xf32> -> vector<8x8xf32>
    %124 = arith.addf %117, %123 : vector<8x8xf32>
    %c5_57 = arith.constant 5 : index
    %c0_58 = arith.constant 0 : index
    %125 = vector.load %arg4[%c5_57, %c0_58] : memref<6x8xf32, #tpu.memory_space<vmem>>, vector<1x8xf32>
    %126 = vector.broadcast %125 : vector<1x8xf32> to vector<8x8xf32>
    %127 = arith.addf %124, %126 : vector<8x8xf32>
    %c0_59 = arith.constant 0 : index
    %c0_60 = arith.constant 0 : index
    %128 = vector.load %arg5[%c0_59, %c0_60] : memref<8x8xf32, #tpu.memory_space<vmem>>, vector<8x8xf32>
    tpu.vector_store %arg5[%c0_59, %c0_60], %127 {strides = array<i32>} : memref<8x8xf32, #tpu.memory_space<vmem>>, vector<8x8xf32>,
    return
  }
}

</mosaic_0001>

<bundles_post_ra>
// kernel: model_forward.1
= control target key start
LH: loop header
LB: loop body
LE: loop exit
PB: predicated region body
PF: predicated region fallthrough
CT: control target
= control target key end

     0   :  { %10 = vsyncpa [#allocation3], 0  ;;  %s4625_s0 = inlined_call_operand.vmem [shape: f32[8,8], index: 0, kind: input, shape index: {}]   ;;  %s4626_s1 = inlined_call_operand.vmem [shape: f32[8,8], index: 1, kind: input, shape index: {}]   ;;  %s4627_s2 = inlined_call_operand.vmem [shape: f32[8,8], index: 2, kind: input, shape index: {}]   ;;  %s4628_s3 = inlined_call_operand.hbm [shape: f32[8,8,8], index: 3, kind: input, shape index: {}]   ;;  %s4629_s4 = inlined_call_operand.hbm [shape: f32[6,8], index: 4, kind: input, shape index: {}]   ;;  %s4630_s5 = inlined_call_operand.hbm [shape: f32[8,8], index: 5, kind: output, shape index: {}]  }
   0x1   :  { %11 = vsyncpa [#allocation6], 0 }
   0x2   :  { %12 = vsyncpa [#allocation4], 0  ;;  %s4276_s18 = smov [#allocation2]   ;;  %s4204_s22 = scalar_lea.hbm %s4628_s3, 1024 }
   0x3   :  { %s24_s19 = sshll.u32 %s4276_s18, 4  ;;  %p4205_p0 = scmp.ne.s32.totalorder %s4628_s3, %s4204_s22  ;;  %s25_s19 = int_to_ptr.vmem [resolvable:$true] %s24_s19 }
   0x4   :  { %p4208_p1 = scmp.lt.u32.totalorder %s4204_s22, %s4628_s3 }
   0x6   :  { %p4210_p2 = pnand %p4208_p1, %p4205_p0 }
   0x8   :  { %4213 = shalt.err (!%p4210_p2)
}
   0x9   :  { %s4214_s27 = scalar_lea.vmem %s25_s19, 1024  ;;  %p4219_p4 = scmp.lt.s32.totalorder %s25_s19, %s25_s19 }
   0xa   :  { %p4215_p3 = scmp.ne.s32.totalorder %s25_s19, %s4214_s27  ;;  %p4220_p5 = scmp.lt.s32.totalorder %s4214_s27, %s4214_s27 }
   0xc   :  { %p4221_p6 = por %p4220_p5, %p4219_p4 }
   0xe   :  { %p4222_p7 = pnand %p4221_p6, %p4215_p3 }
  0x10   :  { %4225 = shalt.err (!%p4222_p7)
}
  0x11   :  { %s4277_s28 = smov 128   ;;  %s4278_s29 = smov 8  }
  0x12   :  { %30 = dma.hbm_to_vmem [thread:$0]  %s4628_s3, 1024, %s25_s19, [#allocation3], %s4277_s28, %s4277_s28, %s4278_s29  }
  0x13   :  { %s4279_s7 = smov [#allocation5]   ;;  %s4226_s11 = scalar_lea.hbm %s4629_s4, 128 }
  0x14   :  { %s37_s8 = sshll.u32 %s4279_s7, 4  ;;  %p4227_p8 = scmp.ne.s32.totalorder %s4629_s4, %s4226_s11  ;;  %s38_s8 = int_to_ptr.vmem [resolvable:$true] %s37_s8 }
  0x15   :  { %p4230_p9 = scmp.lt.u32.totalorder %s4226_s11, %s4629_s4 }
  0x17   :  { %p4232_p10 = pnand %p4230_p9, %p4227_p8 }
  0x19   :  { %4235 = shalt.err (!%p4232_p10)
}
  0x1a   :  { %s4236_s16 = scalar_lea.vmem %s38_s8, 128  ;;  %p4241_p12 = scmp.lt.s32.totalorder %s38_s8, %s38_s8 }
  0x1b   :  { %p4237_p11 = scmp.ne.s32.totalorder %s38_s8, %s4236_s16  ;;  %p4242_p13 = scmp.lt.s32.totalorder %s4236_s16, %s4236_s16 }
  0x1d   :  { %p4243_p0 = por %p4242_p13, %p4241_p12 }
  0x1f   :  { %p4244_p1 = pnand %p4243_p0, %p4237_p11 }
  0x21   :  { %4247 = shalt.err (!%p4244_p1)
}
  0x22   :  { %40 = dma.hbm_to_vmem [thread:$0]  %s4629_s4, 128, %s38_s8, [#allocation6]  }
  0x23   :  { %4270 = dma.done.wait [#allocation3], 1024  }
  0x24   :  { %4271 = vsyncadd [#allocation3], 4294966272 }
  0x25   :  { %4272 = dma.done.wait [#allocation6], 128  }
  0x26   :  { %4273 = vsyncadd [#allocation6], 4294967168  ;;  %v4280_v0 = vmov 0.0   ;;  %vm4281_vm0 = vmmov 0   ;;  %vm64_vm1 = vcmask 64512   ;;  %v58_v1 = vld [vmem:[#allocation2] sm:$0xff]  ;;  %v47_v52 = vlaneseq }
  0x27   :  { %3885 = vmatprep.subr.mxu0 %v4280_v0  ;;  %3915 = vmatprep.subr.mxu1 %v4280_v0  ;;  %v515_v2 = vld [vmem:[#allocation2 + $0x8] sm:$0xff]  ;;  %v55_v3 = vld [vmem:[%s4625_s0] sm:$0xff]  ;;  %v4347_v4 = vand.u32 4294901760, %v58_v1  ;;  %v971_v28 = vld [vmem:[#allocation2 + $0x10] sm:$0xff]  ;;  %vm4282_vm6 = vmmov 1  }
  0x28   :  { %3887 = vmatprep.mubr.msk.f32.mxu0 %vm4281_vm0, %v4280_v0  ;;  %3917 = vmatprep.mubr.msk.f32.mxu1 %vm4281_vm0, %v4280_v0  ;;  %v4349_v5 = vand.u32 4294901760, %v515_v2  ;;  %v66_v6 = vsel %vm64_vm1, %v55_v3, 0  ;;  %v56_v7 = vld [vmem:[%s4626_s1] sm:$0xff]  ;;  %v1424_v30 = vld [vmem:[#allocation2 + $0x18] sm:$0xff]  ;;  %v4406_v31 = vand.u32 4294901760, %v971_v28  ;;  %v4520_v55 = vand.u32 127, %v47_v52 }
  0x29   :  { %v4355_v8 = vand.u32 4294901760, %v66_v6  ;;  %v522_v9 = vsel %vm64_vm1, %v56_v7, 0  ;;  %3886 = vmatpush3.msra.mxu0 %v4347_v4  ;;  %v146_v10 = vsub.f32 %v58_v1, %v4347_v4  ;;  %v57_v27 = vld [vmem:[%s4627_s2] sm:$0xff]  ;;  %v4415_v33 = vand.u32 4294901760, %v1424_v30  ;;  %s4283_s2 = smov [#allocation7]  }
  0x2a   :  { %3916 = vmatpush3.msra.mxu1 %v4349_v5  ;;  %v602_v11 = vsub.f32 %v515_v2, %v4349_v5  ;;  %v4362_v12 = vand.u32 4294901760, %v522_v9  ;;  %3890 = vmatprep.subr.mxu0 %v4280_v0  ;;  %v1431_v29 = vsel %vm64_vm1, %v57_v27, 0  ;;  %v1055_v34 = vsub.f32 %v971_v28, %v4406_v31  ;;  %v1880_v46 = vld [vmem:[#allocation2 + $0x20] sm:$0xff]  ;;  %s3773_s21 = sshll.u32 %s4283_s2, 4  ;;  %s3774_s21 = int_to_ptr.vmem [resolvable:$true] %s3773_s21 }
  0x2b   :  { %v135_v13 = vsub.f32 %v66_v6, %v4355_v8  ;;  %3920 = vmatprep.subr.mxu1 %v4280_v0  ;;  %v147_v15 = vand.u32 4294901760, %v146_v10  ;;  %v4410_v32 = vand.u32 4294901760, %v1431_v29  ;;  %v1511_v36 = vsub.f32 %v1424_v30, %v4415_v33  ;;  %v3783_v53 = vld [vmem:[#allocation5] ss:$0 sm:$0xff]  ;;  %v3784_v54 = vld [vmem:[#allocation5 + $0x1] ss:$0 sm:$0xff]  ;;  %p4253_p3 = scmp.lt.s32.totalorder %s3774_s21, %s3774_s21 }
  0x2c   :  { %v4368_v14 = vsub.f32 %v522_v9, %v4362_v12  ;;  %v603_v16 = vand.u32 4294901760, %v602_v11  ;;  %v1056_v37 = vand.u32 4294901760, %v1055_v34  ;;  %v1887_v47 = vand.u32 4294901760, %v1880_v46  ;;  %v3785_v3 = vld [vmem:[#allocation5 + $0x2] ss:$0 sm:$0xff]  ;;  %s4248_s22 = scalar_lea.vmem %s3774_s21, 128 }
  0x2d   :  { %v136_v17 = vand.u32 4294901760, %v135_v13  ;;  %v148_v19 = vsub.f32 %v146_v10, %v147_v15  ;;  %v4420_v35 = vsub.f32 %v1431_v29, %v4410_v32  ;;  %v1512_v39 = vand.u32 4294901760, %v1511_v36  ;;  %p4249_p2 = scmp.ne.s32.totalorder %s3774_s21, %s4248_s22  ;;  %p4254_p4 = scmp.lt.s32.totalorder %s4248_s22, %s4248_s22 }
  0x2e   :  { %v4371_v18 = vand.u32 4294901760, %v4368_v14  ;;  %v604_v20 = vsub.f32 %v602_v11, %v603_v16  ;;  %v1057_v40 = vsub.f32 %v1055_v34, %v1056_v37  ;;  %v1964_v48 = vsub.f32 %v1880_v46, %v1887_v47 }
  0x2f   :  { %v137_v21 = vsub.f32 %v135_v13, %v136_v17  ;;  %v149_v23 = vand.u32 4294901760, %v148_v19  ;;  %v4430_v38 = vand.u32 4294901760, %v4420_v35  ;;  %v1513_v42 = vsub.f32 %v1511_v36, %v1512_v39  ;;  %p4255_p5 = por %p4254_p4, %p4253_p3 }
  0x30   :  { %v593_v22 = vsub.f32 %v4368_v14, %v4371_v18  ;;  %v605_v25 = vand.u32 4294901760, %v604_v20  ;;  %v1058_v43 = vand.u32 4294901760, %v1057_v40  ;;  %v1965_v49 = vand.u32 4294901760, %v1964_v48 }
  0x31   :  { %v138_v24 = vand.u32 4294901760, %v137_v21  ;;  %v1502_v41 = vsub.f32 %v4420_v35, %v4430_v38  ;;  %v1514_v45 = vand.u32 4294901760, %v1513_v42  ;;  %vm51_vm2 = vcmp.lt.s32.totalorder %v4520_v55, 4  ;;  %p4256_p6 = pnand %p4255_p5, %p4249_p2 }
  0x32   :  { %v4375_v26 = vand.u32 4294901760, %v593_v22  ;;  %v1966_v50 = vsub.f32 %v1964_v48, %v1965_v49  ;;  %v50_v19 = vshrl.u32 %v47_v52, 7 }
  0x33   :  { %3888 = vmatmul.mubr.f32.vlgmr.msra.gmra.mrb[0].mxu0 %v138_v24  ;;  %v1503_v44 = vand.u32 4294901760, %v1502_v41 }
  0x34   :  { %3918 = vmatmul.mubr.f32.vlgmr.msra.gmra.mrb[0].mxu1 %v4375_v26  ;;  %3891 = vmatpush3.msra.mxu0 %v149_v23  ;;  %v1967_v51 = vand.u32 4294901760, %v1966_v50  ;;  %vm52_vm3 = vcmp.lt.s32.totalorder %v50_v19, 4 }
  0x35   :  { %3892 = vmatprep.mubr.msk.f32.mxu0 %vm4281_vm0, %v4280_v0  ;;  %3921 = vmatpush3.msra.mxu1 %v605_v25 }
  0x36   :  { %3922 = vmatprep.mubr.msk.f32.mxu1 %vm4281_vm0, %v4280_v0  ;;  %3895 = vmatprep.subr.mxu0 %v4280_v0 }
  0x37   :  { %3925 = vmatprep.subr.mxu1 %v4280_v0 }
  0x3b   :  { %3893 = vmatmul.mubr.f32.vlgmr.msra.gmra.mrb[0].mxu0 %v4355_v8 }
  0x3c   :  { %3923 = vmatmul.mubr.f32.vlgmr.msra.gmra.mrb[0].mxu1 %v4362_v12  ;;  %3896 = vmatpush3.msra.mxu0 %v146_v10 }
  0x3d   :  { %3897 = vmatprep.mubr.msk.f32.mxu0 %vm4281_vm0, %v4280_v0  ;;  %3926 = vmatpush3.msra.mxu1 %v602_v11 }
  0x3e   :  { %3927 = vmatprep.mubr.msk.f32.mxu1 %vm4281_vm0, %v4280_v0  ;;  %3900 = vmatprep.subr.mxu0 %v4280_v0 }
  0x3f   :  { %3930 = vmatprep.subr.mxu1 %v4280_v0 }
  0x43   :  { %3898 = vmatmul.mubr.f32.vlgmr.msra.gmra.mrb[0].mxu0 %v135_v13 }
  0x44   :  { %3928 = vmatmul.mubr.f32.vlgmr.msra.gmra.mrb[0].mxu1 %v4368_v14  ;;  %3901 = vmatpush3.msra.mxu0 %v4347_v4 }
  0x45   :  { %3902 = vmatprep.mubr.msk.f32.mxu0 %vm4281_vm0, %v4280_v0  ;;  %3931 = vmatpush3.msra.mxu1 %v4349_v5 }
  0x46   :  { %3932 = vmatprep.mubr.msk.f32.mxu1 %vm4281_vm0, %v4280_v0  ;;  %3905 = vmatprep.subr.mxu0 %v4280_v0 }
  0x47   :  { %3935 = vmatprep.subr.mxu1 %v4280_v0 }
  0x4b   :  { %3903 = vmatmul.mubr.f32.vlgmr.msra.gmra.mrb[0].mxu0 %v136_v17 }
  0x4c   :  { %3933 = vmatmul.mubr.f32.vlgmr.msra.gmra.mrb[0].mxu1 %v4371_v18  ;;  %3906 = vmatpush3.msra.mxu0 %v147_v15  ;;  %v4535_v15 = vld [vmem:[#allocation2 + $0x30] sm:$0xff] }
  0x4d   :  { %3907 = vmatprep.mubr.msk.f32.mxu0 %vm4281_vm0, %v4280_v0  ;;  %3936 = vmatpush3.msra.mxu1 %v603_v16  ;;  %v4538_v16 = vand.u32 4294901760, %v4535_v15 }
  0x4e   :  { %3937 = vmatprep.mubr.msk.f32.mxu1 %vm4281_vm0, %v4280_v0  ;;  %3910 = vmatprep.subr.mxu0 %v4280_v0 }
  0x4f   :  { %3940 = vmatprep.subr.mxu1 %v4280_v0 }
  0x53   :  { %3908 = vmatmul.mubr.f32.vlgmr.msra.gmra.mrb[0].mxu0 %v4355_v8 }
  0x54   :  { %3938 = vmatmul.mubr.f32.vlgmr.msra.gmra.mrb[0].mxu1 %v4362_v12  ;;  %3911 = vmatpush3.msra.mxu0 %v4347_v4 }
  0x55   :  { %3912 = vmatprep.mubr.msk.f32.mxu0 %vm4281_vm0, %v4280_v0  ;;  %3941 = vmatpush3.msra.mxu1 %v4349_v5 }
  0x56   :  { %3942 = vmatprep.mubr.msk.f32.mxu1 %vm4281_vm0, %v4280_v0  ;;  %3945 = vmatprep.subr.mxu0 %v4280_v0 }
  0x57   :  { %3975 = vmatprep.subr.mxu1 %v4280_v0 }
  0x5b   :  { %3913 = vmatmul.mubr.f32.vlgmr.msra.gmra.mrb[0].mxu0 %v4355_v8 }
  0x5c   :  { %3943 = vmatmul.mubr.f32.vlgmr.msra.gmra.mrb[0].mxu1 %v4362_v12  ;;  %3946 = vmatpush3.msra.mxu0 %v4406_v31 }
  0x5d   :  { %3947 = vmatprep.mubr.msk.f32.mxu0 %vm4281_vm0, %v4280_v0  ;;  %3950 = vmatprep.subr.mxu0 %v4280_v0 }
  0x5e   :  { %3976 = vmatpush3.msra.mxu1 %v4415_v33  ;;  %3977 = vmatprep.mubr.msk.f32.mxu1 %vm4281_vm0, %v4280_v0 }
  0x5f   :  { %3948 = vmatmul.mubr.f32.vlgmr.msra.gmra.mrb[2].mxu0 %v4375_v26  ;;  %3980 = vmatprep.subr.mxu1 %v4280_v0 }
  0x60   :  { %3951 = vmatpush3.msra.mxu0 %v1058_v43  ;;  %3952 = vmatprep.mubr.msk.f32.mxu0 %vm4281_vm0, %v4280_v0 }
  0x61   :  { %3955 = vmatprep.subr.mxu0 %v4280_v0  ;;  %3978 = vmatmul.mubr.f32.vlgmr.msra.gmra.mrb[2].mxu1 %v1503_v44 }
  0x62   :  { %3981 = vmatpush3.msra.mxu1 %v1514_v45  ;;  %3982 = vmatprep.mubr.msk.f32.mxu1 %vm4281_vm0, %v4280_v0 }
  0x63   :  { %3985 = vmatprep.subr.mxu1 %v4280_v0 }
  0x67   :  { %3953 = vmatmul.mubr.f32.vlgmr.msra.gmra.mrb[2].mxu0 %v4362_v12 }
  0x68   :  { %3956 = vmatpush3.msra.mxu0 %v1055_v34  ;;  %3957 = vmatprep.mubr.msk.f32.mxu0 %vm4281_vm0, %v4280_v0 }
  0x69   :  { %3960 = vmatprep.subr.mxu0 %v4280_v0  ;;  %3983 = vmatmul.mubr.f32.vlgmr.msra.gmra.mrb[2].mxu1 %v4410_v32 }
  0x6a   :  { %3986 = vmatpush3.msra.mxu1 %v1511_v36  ;;  %3987 = vmatprep.mubr.msk.f32.mxu1 %vm4281_vm0, %v4280_v0 }
  0x6b   :  { %3990 = vmatprep.subr.mxu1 %v4280_v0 }
  0x6f   :  { %3958 = vmatmul.mubr.f32.vlgmr.msra.gmra.mrb[2].mxu0 %v4368_v14 }
  0x70   :  { %3961 = vmatpush3.msra.mxu0 %v4406_v31  ;;  %3962 = vmatprep.mubr.msk.f32.mxu0 %vm4281_vm0, %v4280_v0 }
  0x71   :  { %3965 = vmatprep.subr.mxu0 %v4280_v0  ;;  %3988 = vmatmul.mubr.f32.vlgmr.msra.gmra.mrb[2].mxu1 %v4420_v35 }
  0x72   :  { %3991 = vmatpush3.msra.mxu1 %v4415_v33  ;;  %3992 = vmatprep.mubr.msk.f32.mxu1 %vm4281_vm0, %v4280_v0 }
  0x73   :  { %3995 = vmatprep.subr.mxu1 %v4280_v0 }
  0x77   :  { %3963 = vmatmul.mubr.f32.vlgmr.msra.gmra.mrb[2].mxu0 %v4371_v18 }
  0x78   :  { %3966 = vmatpush3.msra.mxu0 %v1056_v37  ;;  %3967 = vmatprep.mubr.msk.f32.mxu0 %vm4281_vm0, %v4280_v0 }
  0x79   :  { %3970 = vmatprep.subr.mxu0 %v4280_v0  ;;  %3993 = vmatmul.mubr.f32.vlgmr.msra.gmra.mrb[2].mxu1 %v4430_v38 }
  0x7a   :  { %3996 = vmatpush3.msra.mxu1 %v1512_v39  ;;  %3997 = vmatprep.mubr.msk.f32.mxu1 %vm4281_vm0, %v4280_v0 }
  0x7b   :  { %4000 = vmatprep.subr.mxu1 %v4280_v0 }
  0x7f   :  { %3968 = vmatmul.mubr.f32.vlgmr.msra.gmra.mrb[2].mxu0 %v4362_v12 }
  0x80   :  { %3971 = vmatpush3.msra.mxu0 %v4406_v31  ;;  %3972 = vmatprep.mubr.msk.f32.mxu0 %vm4281_vm0, %v4280_v0 }
  0x81   :  { %4005 = vmatprep.subr.mxu0 %v4280_v0  ;;  %3998 = vmatmul.mubr.f32.vlgmr.msra.gmra.mrb[2].mxu1 %v4410_v32 }
  0x82   :  { %4001 = vmatpush3.msra.mxu1 %v4415_v33  ;;  %4002 = vmatprep.mubr.msk.f32.mxu1 %vm4281_vm0, %v4280_v0 }
  0x83   :  { %4035 = vmatprep.subr.mxu1 %v4280_v0 }
  0x87   :  { %3973 = vmatmul.mubr.f32.vlgmr.msra.gmra.mrb[2].mxu0 %v4362_v12 }
  0x88   :  { %4006 = vmatpush3.msra.mxu0 %v1887_v47  ;;  %4007 = vmatprep.mubr.msk.f32.mxu0 %vm4281_vm0, %v4280_v0 }
  0x89   :  { %4010 = vmatprep.subr.mxu0 %v4280_v0  ;;  %4003 = vmatmul.mubr.f32.vlgmr.msra.gmra.mrb[2].mxu1 %v4410_v32 }
  0x8a   :  { %4037 = vmatprep.mubr.msk.f32.mxu1 %vm4281_vm0, %v4280_v0  ;;  %4036 = vmatpush3.msra.mxu1 %v4538_v16 }
  0x8b   :  { %4008 = vmatmul.mubr.f32.vlgmr.msra.gmra.mrb[4].mxu0 %v1503_v44  ;;  %4040 = vmatprep.subr.mxu1 %v4280_v0 }
  0x8c   :  { %4011 = vmatpush3.msra.mxu0 %v1967_v51  ;;  %4012 = vmatprep.mubr.msk.f32.mxu0 %vm4281_vm0, %v4280_v0 }
  0x8d   :  { %4015 = vmatprep.subr.mxu0 %v4280_v0 }
  0x93   :  { %4013 = vmatmul.mubr.f32.vlgmr.msra.gmra.mrb[4].mxu0 %v4410_v32 }
  0x94   :  { %4016 = vmatpush3.msra.mxu0 %v1964_v48  ;;  %4017 = vmatprep.mubr.msk.f32.mxu0 %vm4281_vm0, %v4280_v0 }
  0x95   :  { %4020 = vmatprep.subr.mxu0 %v4280_v0 }
  0x9b   :  { %4018 = vmatmul.mubr.f32.vlgmr.msra.gmra.mrb[4].mxu0 %v4420_v35 }
  0x9c   :  { %4021 = vmatpush3.msra.mxu0 %v1887_v47  ;;  %4022 = vmatprep.mubr.msk.f32.mxu0 %vm4281_vm0, %v4280_v0 }
  0x9d   :  { %4025 = vmatprep.subr.mxu0 %v4280_v0 }
  0xa3   :  { %4023 = vmatmul.mubr.f32.vlgmr.msra.gmra.mrb[4].mxu0 %v4430_v38 }
  0xa4   :  { %4026 = vmatpush3.msra.mxu0 %v1965_v49  ;;  %4027 = vmatprep.mubr.msk.f32.mxu0 %vm4281_vm0, %v4280_v0 }
  0xa5   :  { %4030 = vmatprep.subr.mxu0 %v4280_v0 }
  0xab   :  { %4028 = vmatmul.mubr.f32.vlgmr.msra.gmra.mrb[4].mxu0 %v4410_v32 }
  0xac   :  { %4031 = vmatpush3.msra.mxu0 %v1887_v47  ;;  %4032 = vmatprep.mubr.msk.f32.mxu0 %vm4281_vm0, %v4280_v0 }
  0xad   :  { %4065 = vmatprep.subr.mxu0 %v4280_v0 }
  0xb3   :  { %4033 = vmatmul.mubr.f32.vlgmr.msra.gmra.mrb[4].mxu0 %v4410_v32 }
  0xb4   :  { %4067 = vmatprep.mubr.msk.f32.mxu0 %vm4281_vm0, %v4280_v0 }
 0x12e   :  { %v510_v56 = vpop.f32.mrb[0].mxu0 }
 0x12f   :  { %v4125_v57 = vadd.f32 %v3783_v53, %v510_v56  ;;  %v966_v58 = vpop.f32.mrb[0].mxu1  ;;  %v3914_v59 = vpop.f32.mrb[1].mxu0 }
 0x130   :  { %v4126_v60 = vadd.f32 %v3784_v54, %v966_v58  ;;  %v3944_v61 = vpop.f32.mrb[1].mxu1 }
 0x132   :  { %v2332_v62 = vmul.f32 %v4126_v60, %v4125_v57 }
 0x134   :  { %v2333_v63 = vsel %vm51_vm2, %v2332_v62, 0.0  ;;  %v2337_v2 = vsel %vm64_vm1, %v2332_v62, 0.0 }
 0x135   :  { %v2334_v1 = vsel %vm64_vm1, %v2333_v63, 0.0 }
 0x136   :  { %2335 = vadd.xlane.f32.xlu0 %v2334_v1 }
 0x13a   :  { %2338 = vadd.xlane.f32.xlu0 %v2337_v2 }
 0x15a   :  { %v1419_v4 = vpop.f32.mrb[2].mxu0 }
 0x15b   :  { %v4127_v5 = vadd.f32 %v3785_v3, %v1419_v4  ;;  %v3974_v6 = vpop.f32.mrb[3].mxu0 }
 0x15c   :  { %v4531_v11 = vpop.f32.mrb[2].mxu1 }
 0x15d   :  { %v2360_v7 = vmul.f32 %v4127_v5, %v4125_v57  ;;  %v4004_v12 = vpop.f32.mrb[3].mxu1 }
 0x15f   :  { %v2361_v8 = vsel %vm51_vm2, %v2360_v7, 0.0  ;;  %v2365_v10 = vsel %vm64_vm1, %v2360_v7, 0.0 }
 0x160   :  { %v2362_v9 = vsel %vm64_vm1, %v2361_v8, 0.0  ;;  %v53_v8 = vand.u32 1, %v50_v19  ;;  %v2492_v19 = vsub.f32 %v4535_v15, %v4538_v16  ;;  %v2861_v15 = vld [vmem:[#allocation2 + $0x38] sm:$0xff] }
 0x161   :  { %2363 = vadd.xlane.f32.xlu1 %v2362_v9  ;;  %v3786_v9 = vld [vmem:[#allocation5 + $0x3] ss:$0 sm:$0xff] }
 0x162   :  { %vm54_vm4 = vcmp.eq.s32.totalorder %v53_v8, 0 }
 0x163   :  { %vm2403_vm5 = vmxor %vm54_vm4, %vm51_vm2 }
 0x164   :  { %vm2404_vm7 = vmxor %vm2403_vm5, %vm4282_vm6 }
 0x165   :  { %2366 = vadd.xlane.f32.xlu1 %v2365_v10  ;;  %v3787_v10 = vld [vmem:[#allocation5 + $0x4] ss:$0 sm:$0xff] }
 0x186   :  { %v4533_v13 = vpop.f32.mrb[4].mxu0 }
 0x187   :  { %v4034_v14 = vpop.f32.mrb[5].mxu0 }
 0x188   :  { %v4128_v14 = vadd.f32 %v3786_v9, %v4531_v11  ;;  %v2493_v11 = vand.u32 4294901760, %v2492_v19 }
 0x1c3   :  { %v2336_v17 = vpop.xlane.xlu0 %2335 }
 0x1c7   :  { %v2339_v18 = vpop.xlane.xlu0 %2338 }
 0x1c8   :  { %v2340_v20 = vsub.f32 %v2339_v18, %v2336_v17  ;;  %v4129_v18 = vadd.f32 %v3787_v10, %v4533_v13  ;;  %v2494_v13 = vsub.f32 %v2492_v19, %v2493_v11 }
 0x1ca   :  { %v2341_v21 = vsel %vm51_vm2, %v2336_v17, %v2340_v20  ;;  %v2495_v55 = vand.u32 4294901760, %v2494_v13  ;;  %v3788_v13 = vld [vmem:[#allocation5 + $0x5] ss:$0 sm:$0xff] }
 0x1cb   :  { %v2342_v22 = vsel %vm52_vm3, %v2341_v21, 0.0  ;;  %v2350_v24 = vsel %vm64_vm1, %v2341_v21, 0.0 }
 0x1cc   :  { %v2343_v23 = vsel %vm64_vm1, %v2342_v22, 0.0  ;;  %v2351_v26 = vrot.slane %v2350_v24, 4 }
 0x1cd   :  { %v2344_v25 = vrot.slane %v2343_v23, 4 }
 0x1ce   :  { %v2352_v28 = vadd.f32 %v2351_v26, %v2350_v24 }
 0x1cf   :  { %v2345_v27 = vadd.f32 %v2344_v25, %v2343_v23 }
 0x1d0   :  { %v2353_v31 = vrot.slane %v2352_v28, 2 }
 0x1d1   :  { %v2346_v30 = vrot.slane %v2345_v27, 2 }
 0x1d2   :  { %v2354_v35 = vadd.f32 %v2353_v31, %v2352_v28 }
 0x1d3   :  { %v2347_v34 = vadd.f32 %v2346_v30, %v2345_v27 }
 0x1d4   :  { %v2355_v42 = vrot.slane %v2354_v35, 1 }
 0x1d5   :  { %v2348_v41 = vrot.slane %v2347_v34, 1 }
 0x1d6   :  { %v2356_v48 = vadd.f32 %v2355_v42, %v2354_v35 }
 0x1d7   :  { %v2349_v47 = vadd.f32 %v2348_v41, %v2347_v34 }
 0x1d9   :  { %v2357_v53 = vsub.f32 %v2356_v48, %v2349_v47 }
 0x1db   :  { %v2358_v58 = vsel %vm52_vm3, %v2349_v47, %v2357_v53 }
 0x1dc   :  { %v2359_v61 = vmul.f32 0.5, %v2358_v58 }
 0x1ee   :  { %v2364_v29 = vpop.xlane.xlu1 %2363 }
 0x1f2   :  { %v2367_v32 = vpop.xlane.xlu1 %2366 }
 0x1f3   :  { %v2368_v33 = vsub.f32 %v2367_v32, %v2364_v29  ;;  %v2863_v32 = vsel %vm64_vm1, %v2861_v15, 0 }
 0x1f5   :  { %v2369_v36 = vsel %vm51_vm2, %v2364_v29, %v2368_v33  ;;  %v2931_v33 = vand.u32 4294901760, %v2863_v32 }
 0x1f6   :  { %v2370_v37 = vsel %vm52_vm3, %v2369_v36, 0.0  ;;  %v2378_v38 = vsel %vm64_vm1, %v2369_v36, 0.0 }
 0x1f7   :  { %v2371_v39 = vsel %vm64_vm1, %v2370_v37, 0.0  ;;  %v2379_v40 = vrot.slane %v2378_v38, 4  ;;  %v2932_v34 = vsub.f32 %v2863_v32, %v2931_v33 }
 0x1f8   :  { %v2372_v43 = vrot.slane %v2371_v39, 4 }
 0x1f9   :  { %v2380_v44 = vadd.f32 %v2379_v40, %v2378_v38  ;;  %v2933_v35 = vand.u32 4294901760, %v2932_v34  ;;  %v2408_v38 = vld [vmem:[#allocation2 + $0x28] sm:$0xff] }
 0x1fa   :  { %v2373_v45 = vadd.f32 %v2372_v43, %v2371_v39  ;;  %v3315_v43 = vand.u32 4294901760, %v2408_v38 }
 0x1fb   :  { %v2381_v46 = vrot.slane %v2380_v44, 2  ;;  %v2934_v37 = vsub.f32 %v2932_v34, %v2933_v35 }
 0x1fc   :  { %v2374_v49 = vrot.slane %v2373_v45, 2  ;;  %v3392_v47 = vsub.f32 %v2408_v38, %v3315_v43 }
 0x1fd   :  { %v2382_v50 = vadd.f32 %v2381_v46, %v2380_v44  ;;  %v2935_v40 = vand.u32 4294901760, %v2934_v37 }
 0x1fe   :  { %v2375_v51 = vadd.f32 %v2374_v49, %v2373_v45 }
 0x1ff   :  { %v2383_v52 = vrot.slane %v2382_v50, 1 }
 0x200   :  { %v2376_v54 = vrot.slane %v2375_v51, 1 }
 0x201   :  { %v2384_v56 = vadd.f32 %v2383_v52, %v2382_v50 }
 0x202   :  { %v2377_v57 = vadd.f32 %v2376_v54, %v2375_v51  ;;  %v3393_v51 = vand.u32 4294901760, %v3392_v47 }
 0x204   :  { %v2385_v59 = vsub.f32 %v2384_v56, %v2377_v57  ;;  %v3394_v53 = vsub.f32 %v3392_v47, %v3393_v51 }
 0x206   :  { %v2386_v60 = vsel %vm52_vm3, %v2377_v57, %v2385_v59  ;;  %v3395_v56 = vand.u32 4294901760, %v3394_v53 }
 0x207   :  { %v2387_v62 = vmul.f32 0.5, %v2386_v60 }
 0x209   :  { %v2388_v63 = vmax.f32 %v2359_v61, %v2387_v62 }
 0x20b   :  { %v2392_v1 = vsub.f32 %v2387_v62, %v2388_v63  ;;  %v2389_v2 = vsub.f32 %v2359_v61, %v2388_v63 }
 0x20d   :  { %v2393_v3 = vmul.f32 1.442695, %v2392_v1  ;;  %v2390_v4 = vmul.f32 1.442695, %v2389_v2 }
 0x20f   :  { %4198 = vpow2.f32 %v2393_v3 }
 0x210   :  { %4200 = vpow2.f32 %v2390_v4 }
 0x219   :  { %v4199_v5 = vpop.eup %4198 }
 0x21a   :  { %v4201_v6 = vpop.eup %4200 }
 0x21b   :  { %v2395_v7 = vadd.f32 %v4201_v6, %v4199_v5 }
 0x21d   :  { %4202 = vrcp.f32 %v2395_v7 }
 0x227   :  { %v4203_v12 = vpop.eup %4202 }
 0x228   :  { %v2398_v17 = vmul.f32 %v4203_v12, %v4201_v6  ;;  %v2400_v20 = vmul.f32 %v4203_v12, %v4199_v5 }
 0x22a   :  { %v2399_v21 = vmul.f32 %v4128_v14, %v2398_v17  ;;  %v2401_v22 = vmul.f32 %v4129_v18, %v2400_v20 }
 0x22c   :  { %v2402_v23 = vadd.f32 %v2401_v22, %v2399_v21 }
 0x22e   :  { %v2405_v24 = vsel %vm2404_vm7, %v2402_v23, 0.0 }
 0x22f   :  { %v2406_v25 = vsub.f32 %v2402_v23, %v2405_v24  ;;  %v3312_v36 = vsel %vm64_vm1, %v2405_v24, 0 }
 0x231   :  { %v2412_v26 = vsel %vm64_vm1, %v2406_v25, 0 }
 0x232   :  { %v2480_v27 = vand.u32 4294901760, %v2412_v26 }
 0x234   :  { %v2481_v28 = vsub.f32 %v2412_v26, %v2480_v27 }
 0x236   :  { %v2482_v29 = vand.u32 4294901760, %v2481_v28 }
 0x238   :  { %v2483_v30 = vsub.f32 %v2481_v28, %v2482_v29 }
 0x23a   :  { %v2484_v31 = vand.u32 4294901760, %v2483_v30 }
 0x23c   :  { %4038 = vmatmul.mubr.f32.vlgmr.msra.gmra.mrb[4].mxu1 %v2484_v31 }
 0x23d   :  { %4041 = vmatpush3.msra.mxu1 %v2495_v55  ;;  %4042 = vmatprep.mubr.msk.f32.mxu1 %vm4281_vm0, %v4280_v0 }
 0x23e   :  { %4045 = vmatprep.subr.mxu1 %v4280_v0 }
 0x244   :  { %4043 = vmatmul.mubr.f32.vlgmr.msra.gmra.mrb[4].mxu1 %v2480_v27 }
 0x245   :  { %4046 = vmatpush3.msra.mxu1 %v2492_v19  ;;  %4047 = vmatprep.mubr.msk.f32.mxu1 %vm4281_vm0, %v4280_v0 }
 0x246   :  { %4050 = vmatprep.subr.mxu1 %v4280_v0 }
 0x24c   :  { %4048 = vmatmul.mubr.f32.vlgmr.msra.gmra.mrb[4].mxu1 %v2481_v28 }
 0x24d   :  { %4051 = vmatpush3.msra.mxu1 %v4538_v16  ;;  %4052 = vmatprep.mubr.msk.f32.mxu1 %vm4281_vm0, %v4280_v0 }
 0x24e   :  { %4055 = vmatprep.subr.mxu1 %v4280_v0 }
 0x254   :  { %4053 = vmatmul.mubr.f32.vlgmr.msra.gmra.mrb[4].mxu1 %v2482_v29 }
 0x255   :  { %4056 = vmatpush3.msra.mxu1 %v2493_v11  ;;  %4057 = vmatprep.mubr.msk.f32.mxu1 %vm4281_vm0, %v4280_v0 }
 0x256   :  { %4060 = vmatprep.subr.mxu1 %v4280_v0 }
 0x25c   :  { %4058 = vmatmul.mubr.f32.vlgmr.msra.gmra.mrb[4].mxu1 %v2480_v27 }
 0x25d   :  { %4061 = vmatpush3.msra.mxu1 %v4538_v16  ;;  %4062 = vmatprep.mubr.msk.f32.mxu1 %vm4281_vm0, %v4280_v0  ;;  %v3380_v16 = vand.u32 4294901760, %v3312_v36 }
 0x25e   :  { %4070 = vmatprep.subr.mxu1 %v4280_v0 }
 0x25f   :  { %v3381_v44 = vsub.f32 %v3312_v36, %v3380_v16 }
 0x261   :  { %v3382_v49 = vand.u32 4294901760, %v3381_v44 }
 0x263   :  { %v3383_v52 = vsub.f32 %v3381_v44, %v3382_v49 }
 0x264   :  { %4063 = vmatmul.mubr.f32.vlgmr.msra.gmra.mrb[4].mxu1 %v2480_v27 }
 0x265   :  { %4072 = vmatprep.mubr.msk.f32.mxu1 %vm4281_vm0, %v4280_v0  ;;  %v3384_v54 = vand.u32 4294901760, %v3383_v52 }
 0x337   :  { %v2856_v39 = vpop.f32.mrb[4].mxu1 }
 0x338   :  { %v2866_v41 = vand.u32 4294901760, %v2856_v39  ;;  %v4064_v42 = vpop.f32.mrb[5].mxu1 }
 0x33a   :  { %v2943_v45 = vsub.f32 %v2856_v39, %v2866_v41  ;;  %4066 = vmatpush3.msra.mxu0 %v2866_v41 }
 0x33b   :  { %4068 = vmatmul.mubr.f32.vlgmr.msra.gmra.mrb[6].mxu0 %v2935_v40  ;;  %4075 = vmatprep.subr.mxu0 %v4280_v0 }
 0x33c   :  { %v2944_v46 = vand.u32 4294901760, %v2943_v45  ;;  %4076 = vmatpush3.msra.mxu0 %v2943_v45  ;;  %4077 = vmatprep.mubr.msk.f32.mxu0 %vm4281_vm0, %v4280_v0 }
 0x33d   :  { %4085 = vmatprep.subr.mxu0 %v4280_v0 }
 0x33e   :  { %v2945_v48 = vsub.f32 %v2943_v45, %v2944_v46 }
 0x33f   :  { %4078 = vmatmul.mubr.f32.vlgmr.msra.gmra.mrb[8].mxu0 %v2932_v34 }
 0x340   :  { %v2946_v50 = vand.u32 4294901760, %v2945_v48  ;;  %4086 = vmatpush3.msra.mxu0 %v2944_v46  ;;  %4087 = vmatprep.mubr.msk.f32.mxu0 %vm4281_vm0, %v4280_v0 }
 0x341   :  { %4095 = vmatprep.subr.mxu0 %v4280_v0 }
 0x342   :  { %4071 = vmatpush3.msra.mxu1 %v2946_v50 }
 0x343   :  { %4073 = vmatmul.mubr.f32.vlgmr.msra.gmra.mrb[6].mxu1 %v2931_v33  ;;  %4080 = vmatprep.subr.mxu1 %v4280_v0 }
 0x344   :  { %4088 = vmatmul.mubr.f32.vlgmr.msra.gmra.mrb[10].mxu0 %v2931_v33  ;;  %4081 = vmatpush3.msra.mxu1 %v2866_v41 }
 0x345   :  { %4082 = vmatprep.mubr.msk.f32.mxu1 %vm4281_vm0, %v4280_v0  ;;  %4090 = vmatprep.subr.mxu1 %v4280_v0 }
 0x346   :  { %4096 = vmatpush3.msra.mxu0 %v3315_v43  ;;  %4097 = vmatprep.mubr.msk.f32.mxu0 %vm4281_vm0, %v4280_v0 }
 0x347   :  { %4083 = vmatmul.mubr.f32.vlgmr.msra.gmra.mrb[8].mxu1 %v2933_v35  ;;  %4105 = vmatprep.subr.mxu0 %v4280_v0 }
 0x348   :  { %4091 = vmatpush3.msra.mxu1 %v2866_v41  ;;  %4098 = vmatmul.mubr.f32.vlgmr.msra.gmra.mrb[12].mxu0 %v3384_v54 }
 0x349   :  { %4092 = vmatprep.mubr.msk.f32.mxu1 %vm4281_vm0, %v4280_v0  ;;  %4106 = vmatpush3.msra.mxu0 %v3392_v47 }
 0x34a   :  { %4107 = vmatprep.mubr.msk.f32.mxu0 %vm4281_vm0, %v4280_v0  ;;  %4100 = vmatprep.subr.mxu1 %v4280_v0 }
 0x34b   :  { %4093 = vmatmul.mubr.f32.vlgmr.msra.gmra.mrb[10].mxu1 %v2931_v33  ;;  %4115 = vmatprep.subr.mxu0 %v4280_v0 }
 0x34c   :  { %4108 = vmatmul.mubr.f32.vlgmr.msra.gmra.mrb[14].mxu0 %v3381_v44  ;;  %4101 = vmatpush3.msra.mxu1 %v3395_v56 }
 0x34d   :  { %4102 = vmatprep.mubr.msk.f32.mxu1 %vm4281_vm0, %v4280_v0  ;;  %4116 = vmatpush3.msra.mxu0 %v3393_v51 }
 0x34e   :  { %4117 = vmatprep.mubr.msk.f32.mxu0 %vm4281_vm0, %v4280_v0  ;;  %4110 = vmatprep.subr.mxu1 %v4280_v0 }
 0x34f   :  { %4103 = vmatmul.mubr.f32.vlgmr.msra.gmra.mrb[12].mxu1 %v3380_v16 }
 0x350   :  { %4118 = vmatmul.mubr.f32.vlgmr.msra.gmra.mrb[16].mxu0 %v3380_v16  ;;  %4111 = vmatpush3.msra.mxu1 %v3315_v43 }
 0x351   :  { %4112 = vmatprep.mubr.msk.f32.mxu1 %vm4281_vm0, %v4280_v0  ;;  %4120 = vmatprep.subr.mxu1 %v4280_v0 }
 0x353   :  { %4113 = vmatmul.mubr.f32.vlgmr.msra.gmra.mrb[14].mxu1 %v3382_v49 }
 0x354   :  { %4121 = vmatpush3.msra.mxu1 %v3315_v43  ;;  %4122 = vmatprep.mubr.msk.f32.mxu1 %vm4281_vm0, %v4280_v0 }
 0x357   :  { %4123 = vmatmul.mubr.f32.vlgmr.msra.gmra.mrb[16].mxu1 %v3380_v16 }
 0x40e   :  { %v2937_v57 = vpop.f32.mrb[6].mxu0 }
 0x40f   :  { %v4069_v58 = vpop.f32.mrb[7].mxu0 }
 0x412   :  { %v3087_v59 = vpop.f32.mrb[8].mxu0 }
 0x413   :  { %v4079_v60 = vpop.f32.mrb[9].mxu0 }
 0x416   :  { %v3013_v61 = vpop.f32.mrb[6].mxu1 }
 0x417   :  { %v3014_v62 = vadd.f32 %v3013_v61, %v2937_v57  ;;  %v3235_v63 = vpop.f32.mrb[10].mxu0  ;;  %v4074_v1 = vpop.f32.mrb[7].mxu1 }
 0x418   :  { %v4089_v2 = vpop.f32.mrb[11].mxu0 }
 0x419   :  { %v3088_v3 = vadd.f32 %v3087_v59, %v3014_v62 }
 0x41a   :  { %v3161_v4 = vpop.f32.mrb[8].mxu1 }
 0x41b   :  { %v3162_v5 = vadd.f32 %v3161_v4, %v3088_v3  ;;  %v3386_v6 = vpop.f32.mrb[12].mxu0  ;;  %v4084_v7 = vpop.f32.mrb[9].mxu1 }
 0x41c   :  { %v4099_v8 = vpop.f32.mrb[13].mxu0 }
 0x41d   :  { %v3236_v9 = vadd.f32 %v3235_v63, %v3162_v5 }
 0x41e   :  { %v3307_v10 = vpop.f32.mrb[10].mxu1 }
 0x41f   :  { %v3308_v12 = vadd.f32 %v3307_v10, %v3236_v9  ;;  %v3536_v0 = vpop.f32.mrb[14].mxu0  ;;  %v4094_v14 = vpop.f32.mrb[11].mxu1 }
 0x420   :  { %v4109_v17 = vpop.f32.mrb[15].mxu0 }
 0x421   :  { %v3387_v18 = vadd.f32 %v3386_v6, %v3308_v12 }
 0x422   :  { %v3462_v20 = vpop.f32.mrb[12].mxu1 }
 0x423   :  { %v3463_v21 = vadd.f32 %v3462_v20, %v3387_v18  ;;  %v3684_v22 = vpop.f32.mrb[16].mxu0  ;;  %v4104_v23 = vpop.f32.mrb[13].mxu1 }
 0x424   :  { %v4119_v19 = vpop.f32.mrb[17].mxu0 }
 0x425   :  { %v3537_v24 = vadd.f32 %v3536_v0, %v3463_v21 }
 0x426   :  { %v3610_v25 = vpop.f32.mrb[14].mxu1 }
 0x427   :  { %v3611_v26 = vadd.f32 %v3610_v25, %v3537_v24  ;;  %v4114_v11 = vpop.f32.mrb[15].mxu1 }
 0x429   :  { %v3685_v27 = vadd.f32 %v3684_v22, %v3611_v26 }
 0x42a   :  { %v3756_v28 = vpop.f32.mrb[16].mxu1 }
 0x42b   :  { %v3757_v29 = vadd.f32 %v3756_v28, %v3685_v27  ;;  %v4124_v30 = vpop.f32.mrb[17].mxu1 }
 0x42d   :  { %v3765_v55 = vadd.f32 %v3788_v13, %v3757_v29 }
 0x42f   :  { %3766 = vst.msk [vmem:[#allocation7] sm:$0xff] %vm64_vm1, %v3765_v55 }
 0x430   :  { %4259 = shalt.err (!%p4256_p6)
}
 0x431   :  { %s4260_s25 = scalar_lea.hbm %s4630_s5, 128 }
 0x432   :  { %p4261_p7 = scmp.ne.s32.totalorder %s4630_s5, %s4260_s25  ;;  %p4264_p8 = scmp.lt.u32.totalorder %s4260_s25, %s4630_s5 }
 0x434   :  { %p4266_p9 = pnand %p4264_p8, %p4261_p7 }
 0x436   :  { %4269 = shalt.err (!%p4266_p9)
}
 0x437   :  { %3776 = dma.vmem_to_hbm [thread:$0]  %s3774_s21, 128, %s4630_s5, [#allocation4]  }
 0x438   :  { %4274 = dma.done.wait [#allocation4], 128  }
 0x439   :  { %4275 = vsyncadd [#allocation4], 4294967168 }
 0x43a   :  { %3780 = vsyncpa [#allocation3], 1 }
 0x43b   :  { %3781 = vsyncpa [#allocation6], 1 }
 0x43c   :  { %3782 = vsyncpa [#allocation4], 1 }

</bundles_post_ra>
